<compile_context>
chip_gen: v7x
topology: tpu7x:2x2x1
jax: 0.10.0
libtpu: 0.0.40
codegen_flags: <defaults>
</compile_context>

<pallas_src>
import jax
import jax.numpy as jnp
from jax.experimental import pallas as pl
from jax.experimental.pallas import tpu as pltpu


# Candidate lane-dense widths (largest first) — all multiples of 128.
_LANE_WIDTHS = (4096, 2048, 1024, 512, 256, 128)

# Below this many elements a fused XLA cast beats kernel launch + DMA setup.
_MIN_PALLAS_ELEMS = 64 * 1024

# Keep the double-buffered (input + f32 output) tile footprint under ~24 MiB
# so the same tiling fits v5e/v6e (128 MiB VMEM) and v7x (64 MiB per TC) with
# headroom; raise the scoped VMEM limit explicitly.
_VMEM_TILE_BUDGET_BYTES = 24 * 1024 * 1024
_VMEM_LIMIT_BYTES = 48 * 1024 * 1024

# Safety cap on rows per tile (keeps any single DMA descriptor reasonable).
_MAX_TILE_ROWS = 16384


def _cast_kernel(x_ref, o_ref):
    # Elementwise cast to float32 (identity values) — VPU only, no XLU/MXU.
    o_ref[...] = x_ref[...].astype(jnp.float32)


def _cast_2d(x2d):
    """Pallas f32 cast of a lane-dense 2-D slab (last dim a multiple of 128)."""
    R, C = x2d.shape
    in_item = x2d.dtype.itemsize

    # Double-buffered in + out tile bytes ~= 2 * (in_item + 4) * tr * tc.
    max_tile_elems = _VMEM_TILE_BUDGET_BYTES // (2 * (in_item + 4))
    # Round the sublane tile down to a multiple of 32 (covers the stricter
    # int8/uint8 sublane-packing requirement; also a multiple of 16 for bf16
    # and 8 for 32-bit dtypes).  Purely VMEM-budget driven so narrow slabs
    # (C=128) still get big tiles that amortize per-step overhead.
    tr_cap = max(32, (max_tile_elems // C) // 32 * 32)
    tr_cap = min(tr_cap, _MAX_TILE_ROWS)
    tr = R if R <= tr_cap else tr_cap
    tc = C  # already lane-dense (multiple of 128), keep full width

    grid = (pl.cdiv(R, tr),)

    return pl.pallas_call(
        _cast_kernel,
        out_shape=jax.ShapeDtypeStruct((R, C), jnp.float32),
        grid_spec=pltpu.PrefetchScalarGridSpec(
            num_scalar_prefetch=0,
            grid=grid,
            in_specs=[pl.BlockSpec((tr, tc), lambda i: (i, 0))],
            out_specs=pl.BlockSpec((tr, tc), lambda i: (i, 0)),
        ),
        compiler_params=pltpu.CompilerParams(
            dimension_semantics=("parallel",),  # shard rows across v7x's 2 TCs
            vmem_limit_bytes=_VMEM_LIMIT_BYTES,
        ),
        # Pure memory-bound op: give XLA's scheduler an accurate hint.
        cost_estimate=pl.CostEstimate(
            flops=0,
            transcendentals=0,
            bytes_accessed=R * C * (in_item + 4),
        ),
    )(x2d)


def to_tensor(x):
    """Pallas equivalent of ToTensor.forward: cast input to float32."""
    # TODO(synk): the torch.from_numpy / isinstance dispatch is host-side type
    # handling with no device equivalent; jnp.asarray covers it here.
    x = jnp.asarray(x)
    orig_shape = x.shape

    # Already float32 -> the module is a no-op.
    if x.dtype == jnp.float32:
        return x

    total = x.size
    # Tiny inputs: a plain fused cast is cheaper than a pallas_call.
    if total < _MIN_PALLAS_ELEMS:
        return x.astype(jnp.float32)

    flat = x.reshape(-1)

    # Lane-dense reshape: (total // L, L) with L a large multiple of 128 so the
    # f32 output stream is unmasked full-lane stores.
    lane_width = None
    for L in _LANE_WIDTHS:
        if total % L == 0:
            lane_width = L
            break

    if lane_width is not None:
        out2d = _cast_2d(flat.reshape(total // lane_width, lane_width))
        return out2d.reshape(orig_shape)

    # Fallback: element count not divisible by 128 — pad the narrow-dtype input
    # to a multiple of 1024 lanes (< 1024 extra elements), cast, slice back.
    L = 1024
    padded = ((total + L - 1) // L) * L
    flat_p = jnp.pad(flat, (0, padded - total))
    out2d = _cast_2d(flat_p.reshape(padded // L, L))
    return out2d.reshape(-1)[:total].reshape(orig_shape)


if __name__ == "__main__":
    key = jax.random.PRNGKey(0)
    k1, k2 = jax.random.split(key)

    # 1) Small NCHW int input (like numpy image data fed to ToTensor).
    #    Tiny -> short-circuit cast path.
    x_small = jax.random.randint(key, (2, 4, 16, 16), minval=0, maxval=255,
                                 dtype=jnp.int32)
    y_small = jax.block_until_ready(to_tensor(x_small))
    assert y_small.dtype == jnp.float32
    assert y_small.shape == x_small.shape
    assert bool(jnp.all(y_small == x_small.astype(jnp.float32)))

    # 2) Larger NCHW int batch -> exercises the Pallas kernel path
    #    (lane-dense slab: 98304 elems -> (24, 4096)).
    x_img = jax.random.randint(k1, (2, 3, 128, 128), minval=0, maxval=255,
                               dtype=jnp.int32)
    y_img = jax.block_until_ready(to_tensor(x_img))
    assert y_img.dtype == jnp.float32
    assert y_img.shape == x_img.shape
    assert bool(jnp.all(y_img == x_img.astype(jnp.float32)))

    # 3) bf16 input whose element count is NOT a multiple of 128
    #    -> exercises the pad fallback inside the Pallas path.
    x_bf16 = jax.random.normal(k2, (3, 5, 67, 67), dtype=jnp.bfloat16)
    y_bf16 = jax.block_until_ready(to_tensor(x_bf16))
    assert y_bf16.dtype == jnp.float32
    assert y_bf16.shape == x_bf16.shape
    assert bool(jnp.all(y_bf16 == x_bf16.astype(jnp.float32)))

    # 4) uint8 image-like input (typical numpy image fed to ToTensor)
    #    -> exercises narrow-dtype sublane packing with big tiles.
    x_u8 = jax.random.randint(k1, (2, 3, 224, 224), minval=0, maxval=255,
                              dtype=jnp.uint8)
    y_u8 = jax.block_until_ready(to_tensor(x_u8))
    assert y_u8.dtype == jnp.float32
    assert y_u8.shape == x_u8.shape
    assert bool(jnp.all(y_u8 == x_u8.astype(jnp.float32)))

    # 5) Already-float32 input -> no-op path.
    x_f32 = jax.random.normal(k2, (2, 4, 16, 16), dtype=jnp.float32)
    y_f32 = jax.block_until_ready(to_tensor(x_f32))
    assert y_f32.dtype == jnp.float32
    assert bool(jnp.all(y_f32 == x_f32))

    print("KERNEL_OK")
</pallas_src>

<mosaic_0001>
module attributes {stable_mosaic.version = 11 : i64} {
  func.func @_cast_kernel(%arg0: i32, %arg1: memref<24x4096xi32, #tpu.memory_space<vmem>>, %arg2: memref<24x4096xf32, #tpu.memory_space<vmem>>) attributes {dimension_semantics = [#tpu.dimension_semantics<parallel>], iteration_bounds = array<i64: 1>, scalar_prefetch = 0 : i64, scratch_operands = 0 : i64, tpu.core_type = #tpu.core_type<tc>, window_params = [{transform_indices = @transform_0, window_bounds = array<i64: 24, 4096>}, {transform_indices = @transform_1, window_bounds = array<i64: 24, 4096>}]} {
    %c0 = arith.constant 0 : index
    %c0_0 = arith.constant 0 : index
    %0 = vector.load %arg1[%c0, %c0_0] : memref<24x4096xi32, #tpu.memory_space<vmem>>, vector<24x4096xi32>
    %1 = arith.sitofp %0 : vector<24x4096xi32> to vector<24x4096xf32>
    %c0_1 = arith.constant 0 : index
    %c0_2 = arith.constant 0 : index
    %2 = vector.load %arg2[%c0_1, %c0_2] : memref<24x4096xf32, #tpu.memory_space<vmem>>, vector<24x4096xf32>
    tpu.vector_store %arg2[%c0_1, %c0_2], %1 {strides = array<i32>} : memref<24x4096xf32, #tpu.memory_space<vmem>>, vector<24x4096xf32>,
    return
  }
  func.func @transform_0(%arg0: i32) -> (i32, i32) {
    %c0_i32 = arith.constant 0 : i32
    %c0_i32_0 = arith.constant 0 : i32
    return %arg0, %c0_i32 : i32, i32
  }
  func.func @transform_1(%arg0: i32) -> (i32, i32) {
    %c0_i32 = arith.constant 0 : i32
    %c0_i32_0 = arith.constant 0 : i32
    return %arg0, %c0_i32 : i32, i32
  }
}

</mosaic_0001>

<bundles_post_ra>
// kernel: tpu_custom_call.1
= control target key start
LH: loop header
LB: loop body
LE: loop exit
PB: predicated region body
PF: predicated region fallthrough
CT: control target
= control target key end

     0   :  { %6 = vsyncpa [#allocation3], 0  ;;  %s424_s0 = inlined_call_operand.hbm [shape: s32[24,4096], index: 0, kind: input, shape index: {}]   ;;  %s425_s1 = inlined_call_operand.hbm [shape: f32[24,4096], index: 1, kind: output, shape index: {}]  }
   0x1   :  { %7 = vsyncpa [#allocation4], 0  ;;  %s380_s6 = smov [#allocation2]   ;;  %s332_s10 = scalar_lea.hbm %s424_s0, 12288 }
   0x2   :  { %s13_s7 = sshll.u32 %s380_s6, 4  ;;  %p333_p0 = scmp.ne.s32.totalorder %s424_s0, %s332_s10  ;;  %s14_s7 = int_to_ptr.vmem [resolvable:$true] %s13_s7 }
   0x3   :  { %p336_p1 = scmp.lt.u32.totalorder %s332_s10, %s424_s0 }
   0x5   :  { %p338_p2 = pnand %p336_p1, %p333_p0 }
   0x7   :  { %341 = shalt.err (!%p338_p2)
}
   0x8   :  { %s342_s15 = scalar_lea.vmem %s14_s7, 12288  ;;  %p347_p4 = scmp.lt.s32.totalorder %s14_s7, %s14_s7 }
   0x9   :  { %p343_p3 = scmp.ne.s32.totalorder %s14_s7, %s342_s15  ;;  %p348_p5 = scmp.lt.s32.totalorder %s342_s15, %s342_s15 }
   0xb   :  { %p349_p6 = por %p348_p5, %p347_p4 }
   0xd   :  { %p350_p7 = pnand %p349_p6, %p343_p3 }
   0xf   :  { %353 = shalt.err (!%p350_p7)
}
  0x10   :  { %s381_s16 = smov 4096   ;;  %s382_s17 = smov 256  }
  0x11   :  { %19 = dma.hbm_to_vmem [thread:$0]  %s424_s0, 12288, %s14_s7, [#allocation3], %s381_s16, %s381_s16, %s382_s17  }
  0x12   :  { %376 = dma.done.wait [#allocation3], 12288  }
  0x13   :  { %377 = vsyncadd [#allocation3], 4294955008  ;;  %v23_v0 = vld [vmem:[#allocation2] sm:$0xff]  ;;  %v24_v1 = vld [vmem:[#allocation2 + $0x8] sm:$0xff]  ;;  %s383_s0 = smov [#allocation5]  }
  0x14   :  { %v25_v2 = vld [vmem:[#allocation2 + $0x10] sm:$0xff]  ;;  %v119_v3 = vcvt.s32.f32 %v23_v0  ;;  %v120_v4 = vcvt.s32.f32 %v24_v1  ;;  %v26_v6 = vld [vmem:[#allocation2 + $0x18] sm:$0xff]  ;;  %v27_v7 = vld [vmem:[#allocation2 + $0x20] sm:$0xff]  ;;  %s316_s20 = sshll.u32 %s383_s0, 4  ;;  %s317_s20 = int_to_ptr.vmem [resolvable:$true] %s316_s20 }
  0x15   :  { %v121_v5 = vcvt.s32.f32 %v25_v2  ;;  %v28_v8 = vld [vmem:[#allocation2 + $0x28] sm:$0xff]  ;;  %v122_v9 = vcvt.s32.f32 %v26_v6  ;;  %v123_v10 = vcvt.s32.f32 %v27_v7  ;;  %v29_v12 = vld [vmem:[#allocation2 + $0x30] sm:$0xff]  ;;  %v30_v13 = vld [vmem:[#allocation2 + $0x38] sm:$0xff]  ;;  %s354_s21 = scalar_lea.vmem %s317_s20, 12288  ;;  %p359_p9 = scmp.lt.s32.totalorder %s317_s20, %s317_s20 }
  0x16   :  { %v124_v11 = vcvt.s32.f32 %v28_v8  ;;  %v31_v14 = vld [vmem:[#allocation2 + $0x40] sm:$0xff]  ;;  %215 = vst [vmem:[#allocation5] sm:$0xff] %v119_v3  ;;  %216 = vst [vmem:[#allocation5 + $0x8] sm:$0xff] %v120_v4  ;;  %v125_v15 = vcvt.s32.f32 %v29_v12  ;;  %v126_v16 = vcvt.s32.f32 %v30_v13  ;;  %v32_v18 = vld [vmem:[#allocation2 + $0x48] sm:$0xff]  ;;  %p355_p8 = scmp.ne.s32.totalorder %s317_s20, %s354_s21  ;;  %p360_p10 = scmp.lt.s32.totalorder %s354_s21, %s354_s21 }
  0x17   :  { %217 = vst [vmem:[#allocation5 + $0x10] sm:$0xff] %v121_v5  ;;  %v127_v17 = vcvt.s32.f32 %v31_v14  ;;  %v33_v19 = vld [vmem:[#allocation2 + $0x50] sm:$0xff]  ;;  %v34_v20 = vld [vmem:[#allocation2 + $0x58] sm:$0xff]  ;;  %218 = vst [vmem:[#allocation5 + $0x18] sm:$0xff] %v122_v9  ;;  %v128_v21 = vcvt.s32.f32 %v32_v18 }
  0x18   :  { %219 = vst [vmem:[#allocation5 + $0x20] sm:$0xff] %v123_v10  ;;  %220 = vst [vmem:[#allocation5 + $0x28] sm:$0xff] %v124_v11  ;;  %v129_v22 = vcvt.s32.f32 %v33_v19  ;;  %v130_v23 = vcvt.s32.f32 %v34_v20  ;;  %v35_v24 = vld [vmem:[#allocation2 + $0x60] sm:$0xff]  ;;  %v36_v25 = vld [vmem:[#allocation2 + $0x68] sm:$0xff]  ;;  %p361_p11 = por %p360_p10, %p359_p9 }
  0x19   :  { %v37_v26 = vld [vmem:[#allocation2 + $0x70] sm:$0xff]  ;;  %221 = vst [vmem:[#allocation5 + $0x30] sm:$0xff] %v125_v15  ;;  %222 = vst [vmem:[#allocation5 + $0x38] sm:$0xff] %v126_v16  ;;  %v131_v27 = vcvt.s32.f32 %v35_v24  ;;  %v132_v28 = vcvt.s32.f32 %v36_v25  ;;  %v38_v30 = vld [vmem:[#allocation2 + $0x78] sm:$0xff] }
  0x1a   :  { %223 = vst [vmem:[#allocation5 + $0x40] sm:$0xff] %v127_v17  ;;  %v133_v29 = vcvt.s32.f32 %v37_v26  ;;  %v39_v31 = vld [vmem:[#allocation2 + $0x80] sm:$0xff]  ;;  %v40_v32 = vld [vmem:[#allocation2 + $0x88] sm:$0xff]  ;;  %224 = vst [vmem:[#allocation5 + $0x48] sm:$0xff] %v128_v21  ;;  %v134_v33 = vcvt.s32.f32 %v38_v30  ;;  %p362_p12 = pnand %p361_p11, %p355_p8 }
  0x1b   :  { %225 = vst [vmem:[#allocation5 + $0x50] sm:$0xff] %v129_v22  ;;  %226 = vst [vmem:[#allocation5 + $0x58] sm:$0xff] %v130_v23  ;;  %v135_v34 = vcvt.s32.f32 %v39_v31  ;;  %v136_v35 = vcvt.s32.f32 %v40_v32  ;;  %v41_v36 = vld [vmem:[#allocation2 + $0x90] sm:$0xff]  ;;  %v42_v37 = vld [vmem:[#allocation2 + $0x98] sm:$0xff] }
  0x1c   :  { %v43_v38 = vld [vmem:[#allocation2 + $0xa0] sm:$0xff]  ;;  %227 = vst [vmem:[#allocation5 + $0x60] sm:$0xff] %v131_v27  ;;  %228 = vst [vmem:[#allocation5 + $0x68] sm:$0xff] %v132_v28  ;;  %v137_v39 = vcvt.s32.f32 %v41_v36  ;;  %v138_v40 = vcvt.s32.f32 %v42_v37  ;;  %v44_v42 = vld [vmem:[#allocation2 + $0xa8] sm:$0xff] }
  0x1d   :  { %229 = vst [vmem:[#allocation5 + $0x70] sm:$0xff] %v133_v29  ;;  %v139_v41 = vcvt.s32.f32 %v43_v38  ;;  %v45_v43 = vld [vmem:[#allocation2 + $0xb0] sm:$0xff]  ;;  %v46_v44 = vld [vmem:[#allocation2 + $0xb8] sm:$0xff]  ;;  %230 = vst [vmem:[#allocation5 + $0x78] sm:$0xff] %v134_v33  ;;  %v140_v45 = vcvt.s32.f32 %v44_v42 }
  0x1e   :  { %231 = vst [vmem:[#allocation5 + $0x80] sm:$0xff] %v135_v34  ;;  %232 = vst [vmem:[#allocation5 + $0x88] sm:$0xff] %v136_v35  ;;  %v141_v46 = vcvt.s32.f32 %v45_v43  ;;  %v142_v47 = vcvt.s32.f32 %v46_v44  ;;  %v47_v48 = vld [vmem:[#allocation2 + $0xc0] sm:$0xff]  ;;  %v48_v49 = vld [vmem:[#allocation2 + $0xc8] sm:$0xff] }
  0x1f   :  { %v49_v50 = vld [vmem:[#allocation2 + $0xd0] sm:$0xff]  ;;  %233 = vst [vmem:[#allocation5 + $0x90] sm:$0xff] %v137_v39  ;;  %234 = vst [vmem:[#allocation5 + $0x98] sm:$0xff] %v138_v40  ;;  %v143_v51 = vcvt.s32.f32 %v47_v48  ;;  %v144_v52 = vcvt.s32.f32 %v48_v49  ;;  %v50_v54 = vld [vmem:[#allocation2 + $0xd8] sm:$0xff] }
  0x20   :  { %235 = vst [vmem:[#allocation5 + $0xa0] sm:$0xff] %v139_v41  ;;  %v145_v53 = vcvt.s32.f32 %v49_v50  ;;  %v51_v55 = vld [vmem:[#allocation2 + $0xe0] sm:$0xff]  ;;  %v52_v56 = vld [vmem:[#allocation2 + $0xe8] sm:$0xff]  ;;  %236 = vst [vmem:[#allocation5 + $0xa8] sm:$0xff] %v140_v45  ;;  %v146_v57 = vcvt.s32.f32 %v50_v54 }
  0x21   :  { %237 = vst [vmem:[#allocation5 + $0xb0] sm:$0xff] %v141_v46  ;;  %238 = vst [vmem:[#allocation5 + $0xb8] sm:$0xff] %v142_v47  ;;  %v147_v58 = vcvt.s32.f32 %v51_v55  ;;  %v148_v59 = vcvt.s32.f32 %v52_v56  ;;  %v53_v60 = vld [vmem:[#allocation2 + $0xf0] sm:$0xff]  ;;  %v54_v61 = vld [vmem:[#allocation2 + $0xf8] sm:$0xff] }
  0x22   :  { %v55_v62 = vld [vmem:[#allocation2 + $0x100] sm:$0xff]  ;;  %239 = vst [vmem:[#allocation5 + $0xc0] sm:$0xff] %v143_v51  ;;  %240 = vst [vmem:[#allocation5 + $0xc8] sm:$0xff] %v144_v52  ;;  %v149_v63 = vcvt.s32.f32 %v53_v60  ;;  %v150_v0 = vcvt.s32.f32 %v54_v61  ;;  %v56_v2 = vld [vmem:[#allocation2 + $0x108] sm:$0xff] }
  0x23   :  { %241 = vst [vmem:[#allocation5 + $0xd0] sm:$0xff] %v145_v53  ;;  %v151_v1 = vcvt.s32.f32 %v55_v62  ;;  %v57_v3 = vld [vmem:[#allocation2 + $0x110] sm:$0xff]  ;;  %v58_v4 = vld [vmem:[#allocation2 + $0x118] sm:$0xff]  ;;  %242 = vst [vmem:[#allocation5 + $0xd8] sm:$0xff] %v146_v57  ;;  %v152_v5 = vcvt.s32.f32 %v56_v2 }
  0x24   :  { %243 = vst [vmem:[#allocation5 + $0xe0] sm:$0xff] %v147_v58  ;;  %244 = vst [vmem:[#allocation5 + $0xe8] sm:$0xff] %v148_v59  ;;  %v153_v6 = vcvt.s32.f32 %v57_v3  ;;  %v154_v7 = vcvt.s32.f32 %v58_v4  ;;  %v59_v8 = vld [vmem:[#allocation2 + $0x120] sm:$0xff]  ;;  %v60_v9 = vld [vmem:[#allocation2 + $0x128] sm:$0xff] }
  0x25   :  { %v61_v10 = vld [vmem:[#allocation2 + $0x130] sm:$0xff]  ;;  %245 = vst [vmem:[#allocation5 + $0xf0] sm:$0xff] %v149_v63  ;;  %246 = vst [vmem:[#allocation5 + $0xf8] sm:$0xff] %v150_v0  ;;  %v155_v11 = vcvt.s32.f32 %v59_v8  ;;  %v156_v12 = vcvt.s32.f32 %v60_v9  ;;  %v62_v14 = vld [vmem:[#allocation2 + $0x138] sm:$0xff] }
  0x26   :  { %247 = vst [vmem:[#allocation5 + $0x100] sm:$0xff] %v151_v1  ;;  %v157_v13 = vcvt.s32.f32 %v61_v10  ;;  %v63_v15 = vld [vmem:[#allocation2 + $0x140] sm:$0xff]  ;;  %v64_v16 = vld [vmem:[#allocation2 + $0x148] sm:$0xff]  ;;  %248 = vst [vmem:[#allocation5 + $0x108] sm:$0xff] %v152_v5  ;;  %v158_v17 = vcvt.s32.f32 %v62_v14 }
  0x27   :  { %249 = vst [vmem:[#allocation5 + $0x110] sm:$0xff] %v153_v6  ;;  %250 = vst [vmem:[#allocation5 + $0x118] sm:$0xff] %v154_v7  ;;  %v159_v18 = vcvt.s32.f32 %v63_v15  ;;  %v160_v19 = vcvt.s32.f32 %v64_v16  ;;  %v65_v20 = vld [vmem:[#allocation2 + $0x150] sm:$0xff]  ;;  %v66_v21 = vld [vmem:[#allocation2 + $0x158] sm:$0xff] }
  0x28   :  { %v67_v22 = vld [vmem:[#allocation2 + $0x160] sm:$0xff]  ;;  %251 = vst [vmem:[#allocation5 + $0x120] sm:$0xff] %v155_v11  ;;  %252 = vst [vmem:[#allocation5 + $0x128] sm:$0xff] %v156_v12  ;;  %v161_v23 = vcvt.s32.f32 %v65_v20  ;;  %v162_v24 = vcvt.s32.f32 %v66_v21  ;;  %v68_v26 = vld [vmem:[#allocation2 + $0x168] sm:$0xff] }
  0x29   :  { %253 = vst [vmem:[#allocation5 + $0x130] sm:$0xff] %v157_v13  ;;  %v163_v25 = vcvt.s32.f32 %v67_v22  ;;  %v69_v27 = vld [vmem:[#allocation2 + $0x170] sm:$0xff]  ;;  %v70_v28 = vld [vmem:[#allocation2 + $0x178] sm:$0xff]  ;;  %254 = vst [vmem:[#allocation5 + $0x138] sm:$0xff] %v158_v17  ;;  %v164_v29 = vcvt.s32.f32 %v68_v26 }
  0x2a   :  { %255 = vst [vmem:[#allocation5 + $0x140] sm:$0xff] %v159_v18  ;;  %256 = vst [vmem:[#allocation5 + $0x148] sm:$0xff] %v160_v19  ;;  %v165_v30 = vcvt.s32.f32 %v69_v27  ;;  %v166_v31 = vcvt.s32.f32 %v70_v28  ;;  %v71_v32 = vld [vmem:[#allocation2 + $0x180] sm:$0xff]  ;;  %v72_v33 = vld [vmem:[#allocation2 + $0x188] sm:$0xff] }
  0x2b   :  { %v73_v34 = vld [vmem:[#allocation2 + $0x190] sm:$0xff]  ;;  %257 = vst [vmem:[#allocation5 + $0x150] sm:$0xff] %v161_v23  ;;  %258 = vst [vmem:[#allocation5 + $0x158] sm:$0xff] %v162_v24  ;;  %v167_v35 = vcvt.s32.f32 %v71_v32  ;;  %v168_v36 = vcvt.s32.f32 %v72_v33  ;;  %v74_v38 = vld [vmem:[#allocation2 + $0x198] sm:$0xff] }
  0x2c   :  { %259 = vst [vmem:[#allocation5 + $0x160] sm:$0xff] %v163_v25  ;;  %v169_v37 = vcvt.s32.f32 %v73_v34  ;;  %v75_v39 = vld [vmem:[#allocation2 + $0x1a0] sm:$0xff]  ;;  %v76_v40 = vld [vmem:[#allocation2 + $0x1a8] sm:$0xff]  ;;  %260 = vst [vmem:[#allocation5 + $0x168] sm:$0xff] %v164_v29  ;;  %v170_v41 = vcvt.s32.f32 %v74_v38 }
  0x2d   :  { %261 = vst [vmem:[#allocation5 + $0x170] sm:$0xff] %v165_v30  ;;  %262 = vst [vmem:[#allocation5 + $0x178] sm:$0xff] %v166_v31  ;;  %v171_v42 = vcvt.s32.f32 %v75_v39  ;;  %v172_v43 = vcvt.s32.f32 %v76_v40  ;;  %v77_v44 = vld [vmem:[#allocation2 + $0x1b0] sm:$0xff]  ;;  %v78_v45 = vld [vmem:[#allocation2 + $0x1b8] sm:$0xff] }
  0x2e   :  { %v79_v46 = vld [vmem:[#allocation2 + $0x1c0] sm:$0xff]  ;;  %263 = vst [vmem:[#allocation5 + $0x180] sm:$0xff] %v167_v35  ;;  %264 = vst [vmem:[#allocation5 + $0x188] sm:$0xff] %v168_v36  ;;  %v173_v47 = vcvt.s32.f32 %v77_v44  ;;  %v174_v48 = vcvt.s32.f32 %v78_v45  ;;  %v80_v50 = vld [vmem:[#allocation2 + $0x1c8] sm:$0xff] }
  0x2f   :  { %265 = vst [vmem:[#allocation5 + $0x190] sm:$0xff] %v169_v37  ;;  %v175_v49 = vcvt.s32.f32 %v79_v46  ;;  %v81_v51 = vld [vmem:[#allocation2 + $0x1d0] sm:$0xff]  ;;  %v82_v52 = vld [vmem:[#allocation2 + $0x1d8] sm:$0xff]  ;;  %266 = vst [vmem:[#allocation5 + $0x198] sm:$0xff] %v170_v41  ;;  %v176_v53 = vcvt.s32.f32 %v80_v50 }
  0x30   :  { %267 = vst [vmem:[#allocation5 + $0x1a0] sm:$0xff] %v171_v42  ;;  %268 = vst [vmem:[#allocation5 + $0x1a8] sm:$0xff] %v172_v43  ;;  %v177_v54 = vcvt.s32.f32 %v81_v51  ;;  %v178_v55 = vcvt.s32.f32 %v82_v52  ;;  %v83_v56 = vld [vmem:[#allocation2 + $0x1e0] sm:$0xff]  ;;  %v84_v57 = vld [vmem:[#allocation2 + $0x1e8] sm:$0xff] }
  0x31   :  { %v85_v58 = vld [vmem:[#allocation2 + $0x1f0] sm:$0xff]  ;;  %269 = vst [vmem:[#allocation5 + $0x1b0] sm:$0xff] %v173_v47  ;;  %270 = vst [vmem:[#allocation5 + $0x1b8] sm:$0xff] %v174_v48  ;;  %v179_v59 = vcvt.s32.f32 %v83_v56  ;;  %v180_v60 = vcvt.s32.f32 %v84_v57  ;;  %v86_v62 = vld [vmem:[#allocation2 + $0x1f8] sm:$0xff] }
  0x32   :  { %271 = vst [vmem:[#allocation5 + $0x1c0] sm:$0xff] %v175_v49  ;;  %v181_v61 = vcvt.s32.f32 %v85_v58  ;;  %v87_v63 = vld [vmem:[#allocation2 + $0x200] sm:$0xff]  ;;  %v88_v0 = vld [vmem:[#allocation2 + $0x208] sm:$0xff]  ;;  %272 = vst [vmem:[#allocation5 + $0x1c8] sm:$0xff] %v176_v53  ;;  %v182_v1 = vcvt.s32.f32 %v86_v62 }
  0x33   :  { %273 = vst [vmem:[#allocation5 + $0x1d0] sm:$0xff] %v177_v54  ;;  %274 = vst [vmem:[#allocation5 + $0x1d8] sm:$0xff] %v178_v55  ;;  %v183_v2 = vcvt.s32.f32 %v87_v63  ;;  %v184_v3 = vcvt.s32.f32 %v88_v0  ;;  %v89_v4 = vld [vmem:[#allocation2 + $0x210] sm:$0xff]  ;;  %v90_v5 = vld [vmem:[#allocation2 + $0x218] sm:$0xff] }
  0x34   :  { %v91_v6 = vld [vmem:[#allocation2 + $0x220] sm:$0xff]  ;;  %275 = vst [vmem:[#allocation5 + $0x1e0] sm:$0xff] %v179_v59  ;;  %276 = vst [vmem:[#allocation5 + $0x1e8] sm:$0xff] %v180_v60  ;;  %v185_v7 = vcvt.s32.f32 %v89_v4  ;;  %v186_v8 = vcvt.s32.f32 %v90_v5  ;;  %v92_v10 = vld [vmem:[#allocation2 + $0x228] sm:$0xff] }
  0x35   :  { %277 = vst [vmem:[#allocation5 + $0x1f0] sm:$0xff] %v181_v61  ;;  %v187_v9 = vcvt.s32.f32 %v91_v6  ;;  %v93_v11 = vld [vmem:[#allocation2 + $0x230] sm:$0xff]  ;;  %v94_v12 = vld [vmem:[#allocation2 + $0x238] sm:$0xff]  ;;  %278 = vst [vmem:[#allocation5 + $0x1f8] sm:$0xff] %v182_v1  ;;  %v188_v13 = vcvt.s32.f32 %v92_v10 }
  0x36   :  { %279 = vst [vmem:[#allocation5 + $0x200] sm:$0xff] %v183_v2  ;;  %280 = vst [vmem:[#allocation5 + $0x208] sm:$0xff] %v184_v3  ;;  %v189_v14 = vcvt.s32.f32 %v93_v11  ;;  %v190_v15 = vcvt.s32.f32 %v94_v12  ;;  %v95_v16 = vld [vmem:[#allocation2 + $0x240] sm:$0xff]  ;;  %v96_v17 = vld [vmem:[#allocation2 + $0x248] sm:$0xff] }
  0x37   :  { %v97_v18 = vld [vmem:[#allocation2 + $0x250] sm:$0xff]  ;;  %281 = vst [vmem:[#allocation5 + $0x210] sm:$0xff] %v185_v7  ;;  %282 = vst [vmem:[#allocation5 + $0x218] sm:$0xff] %v186_v8  ;;  %v191_v19 = vcvt.s32.f32 %v95_v16  ;;  %v192_v20 = vcvt.s32.f32 %v96_v17  ;;  %v98_v22 = vld [vmem:[#allocation2 + $0x258] sm:$0xff] }
  0x38   :  { %283 = vst [vmem:[#allocation5 + $0x220] sm:$0xff] %v187_v9  ;;  %v193_v21 = vcvt.s32.f32 %v97_v18  ;;  %v99_v23 = vld [vmem:[#allocation2 + $0x260] sm:$0xff]  ;;  %v100_v24 = vld [vmem:[#allocation2 + $0x268] sm:$0xff]  ;;  %284 = vst [vmem:[#allocation5 + $0x228] sm:$0xff] %v188_v13  ;;  %v194_v25 = vcvt.s32.f32 %v98_v22 }
  0x39   :  { %285 = vst [vmem:[#allocation5 + $0x230] sm:$0xff] %v189_v14  ;;  %286 = vst [vmem:[#allocation5 + $0x238] sm:$0xff] %v190_v15  ;;  %v195_v26 = vcvt.s32.f32 %v99_v23  ;;  %v196_v27 = vcvt.s32.f32 %v100_v24  ;;  %v101_v28 = vld [vmem:[#allocation2 + $0x270] sm:$0xff]  ;;  %v102_v29 = vld [vmem:[#allocation2 + $0x278] sm:$0xff] }
  0x3a   :  { %v103_v30 = vld [vmem:[#allocation2 + $0x280] sm:$0xff]  ;;  %287 = vst [vmem:[#allocation5 + $0x240] sm:$0xff] %v191_v19  ;;  %288 = vst [vmem:[#allocation5 + $0x248] sm:$0xff] %v192_v20  ;;  %v197_v31 = vcvt.s32.f32 %v101_v28  ;;  %v198_v32 = vcvt.s32.f32 %v102_v29  ;;  %v104_v34 = vld [vmem:[#allocation2 + $0x288] sm:$0xff] }
  0x3b   :  { %289 = vst [vmem:[#allocation5 + $0x250] sm:$0xff] %v193_v21  ;;  %v199_v33 = vcvt.s32.f32 %v103_v30  ;;  %v105_v35 = vld [vmem:[#allocation2 + $0x290] sm:$0xff]  ;;  %v106_v36 = vld [vmem:[#allocation2 + $0x298] sm:$0xff]  ;;  %290 = vst [vmem:[#allocation5 + $0x258] sm:$0xff] %v194_v25  ;;  %v200_v37 = vcvt.s32.f32 %v104_v34 }
  0x3c   :  { %291 = vst [vmem:[#allocation5 + $0x260] sm:$0xff] %v195_v26  ;;  %292 = vst [vmem:[#allocation5 + $0x268] sm:$0xff] %v196_v27  ;;  %v201_v38 = vcvt.s32.f32 %v105_v35  ;;  %v202_v39 = vcvt.s32.f32 %v106_v36  ;;  %v107_v40 = vld [vmem:[#allocation2 + $0x2a0] sm:$0xff]  ;;  %v108_v41 = vld [vmem:[#allocation2 + $0x2a8] sm:$0xff] }
  0x3d   :  { %v109_v42 = vld [vmem:[#allocation2 + $0x2b0] sm:$0xff]  ;;  %293 = vst [vmem:[#allocation5 + $0x270] sm:$0xff] %v197_v31  ;;  %294 = vst [vmem:[#allocation5 + $0x278] sm:$0xff] %v198_v32  ;;  %v203_v43 = vcvt.s32.f32 %v107_v40  ;;  %v204_v44 = vcvt.s32.f32 %v108_v41  ;;  %v110_v46 = vld [vmem:[#allocation2 + $0x2b8] sm:$0xff] }
  0x3e   :  { %295 = vst [vmem:[#allocation5 + $0x280] sm:$0xff] %v199_v33  ;;  %v205_v45 = vcvt.s32.f32 %v109_v42  ;;  %v111_v47 = vld [vmem:[#allocation2 + $0x2c0] sm:$0xff]  ;;  %v112_v48 = vld [vmem:[#allocation2 + $0x2c8] sm:$0xff]  ;;  %296 = vst [vmem:[#allocation5 + $0x288] sm:$0xff] %v200_v37  ;;  %v206_v49 = vcvt.s32.f32 %v110_v46 }
  0x3f   :  { %297 = vst [vmem:[#allocation5 + $0x290] sm:$0xff] %v201_v38  ;;  %298 = vst [vmem:[#allocation5 + $0x298] sm:$0xff] %v202_v39  ;;  %v207_v50 = vcvt.s32.f32 %v111_v47  ;;  %v208_v51 = vcvt.s32.f32 %v112_v48  ;;  %v113_v52 = vld [vmem:[#allocation2 + $0x2d0] sm:$0xff]  ;;  %v114_v53 = vld [vmem:[#allocation2 + $0x2d8] sm:$0xff] }
  0x40   :  { %v115_v54 = vld [vmem:[#allocation2 + $0x2e0] sm:$0xff]  ;;  %299 = vst [vmem:[#allocation5 + $0x2a0] sm:$0xff] %v203_v43  ;;  %300 = vst [vmem:[#allocation5 + $0x2a8] sm:$0xff] %v204_v44  ;;  %v209_v55 = vcvt.s32.f32 %v113_v52  ;;  %v210_v56 = vcvt.s32.f32 %v114_v53  ;;  %v116_v58 = vld [vmem:[#allocation2 + $0x2e8] sm:$0xff] }
  0x41   :  { %301 = vst [vmem:[#allocation5 + $0x2b0] sm:$0xff] %v205_v45  ;;  %v211_v57 = vcvt.s32.f32 %v115_v54  ;;  %v117_v59 = vld [vmem:[#allocation2 + $0x2f0] sm:$0xff]  ;;  %v118_v60 = vld [vmem:[#allocation2 + $0x2f8] sm:$0xff]  ;;  %302 = vst [vmem:[#allocation5 + $0x2b8] sm:$0xff] %v206_v49  ;;  %v212_v61 = vcvt.s32.f32 %v116_v58 }
  0x42   :  { %303 = vst [vmem:[#allocation5 + $0x2c0] sm:$0xff] %v207_v50  ;;  %304 = vst [vmem:[#allocation5 + $0x2c8] sm:$0xff] %v208_v51  ;;  %v213_v62 = vcvt.s32.f32 %v117_v59  ;;  %v214_v63 = vcvt.s32.f32 %v118_v60 }
  0x43   :  { %305 = vst [vmem:[#allocation5 + $0x2d0] sm:$0xff] %v209_v55  ;;  %306 = vst [vmem:[#allocation5 + $0x2d8] sm:$0xff] %v210_v56 }
  0x44   :  { %307 = vst [vmem:[#allocation5 + $0x2e0] sm:$0xff] %v211_v57  ;;  %308 = vst [vmem:[#allocation5 + $0x2e8] sm:$0xff] %v212_v61 }
  0x45   :  { %309 = vst [vmem:[#allocation5 + $0x2f0] sm:$0xff] %v213_v62  ;;  %310 = vst [vmem:[#allocation5 + $0x2f8] sm:$0xff] %v214_v63 }
  0x46   :  { %365 = shalt.err (!%p362_p12)
}
  0x47   :  { %s366_s24 = scalar_lea.hbm %s425_s1, 12288 }
  0x48   :  { %p367_p13 = scmp.ne.s32.totalorder %s425_s1, %s366_s24  ;;  %p370_p0 = scmp.lt.u32.totalorder %s366_s24, %s425_s1 }
  0x4a   :  { %p372_p1 = pnand %p370_p0, %p367_p13 }
  0x4c   :  { %375 = shalt.err (!%p372_p1)
}
  0x4d   :  { %322 = dma.vmem_to_hbm [thread:$0]  %s317_s20, 12288, %s425_s1, [#allocation4], %s381_s16, %s381_s16, %s382_s17  }
  0x4e   :  { %378 = dma.done.wait [#allocation4], 12288  }
  0x4f   :  { %379 = vsyncadd [#allocation4], 4294955008 }
  0x50   :  { %326 = vsyncpa [#allocation3], 1 }
  0x51   :  { %327 = vsyncpa [#allocation4], 1 }

</bundles_post_ra>
